<compile_context>
chip_gen: v5e
topology: v5e:2x2
jax: 0.10.0
libtpu: 0.0.40
codegen_flags: <defaults>
</compile_context>

<pallas_src>
import math

import jax
import jax.numpy as jnp
from jax.experimental import pallas as pl
from jax.experimental.pallas import tpu as pltpu


def _sinusoidal_kernel(t_ref, c_ref, o_ref):
    # t_ref: (TB, 1) f32 time rows
    # c_ref: (2, dim) f32 constants: row 0 = [freqs, freqs], row 1 = [0, pi/2]
    # o_ref: (TB, dim) f32
    f2 = c_ref[0:1, :]        # (1, dim)
    phase = c_ref[1:2, :]     # (1, dim)
    # One full-width lane-dense store: sin(t*f)   on the first half (phase 0),
    #                                  cos(t*f)   on the second   (phase pi/2).
    o_ref[...] = jnp.sin(t_ref[...] * f2 + phase)


def _vmem_budget_bytes() -> int:
    # Per-generation budget for the double-buffered working set:
    #   v5e / v6e (128 MiB VMEM) -> 24 MiB;  v7x (64 MiB per TC) -> 16 MiB.
    try:
        cap = getattr(pltpu.get_tpu_info(), "vmem_capacity_bytes", 64 << 20)
    except Exception:
        cap = 64 << 20  # assume the smallest generation if the query is unavailable
    return min(24 << 20, cap // 4)


def sinusoidal_position_embeddings(time: jax.Array, dim: int) -> jax.Array:
    """time: (B,) float array -> (B, dim) float32 embeddings (PyTorch-identical math)."""
    assert dim % 2 == 0 and dim // 2 > 1, "dim must be even and >= 4"
    half_dim = dim // 2
    B = time.shape[0]

    # Constants hoisted out of the kernel (computed once by XLA), packed into a
    # single VMEM-resident (2, dim) block so only one constant block stays live.
    scale = math.log(10000.0) / (half_dim - 1)
    freqs = jnp.exp(jnp.arange(half_dim, dtype=jnp.float32) * (-scale))
    consts = jnp.stack([
        jnp.concatenate([freqs, freqs]),
        jnp.concatenate([jnp.zeros((half_dim,), jnp.float32),
                         jnp.full((half_dim,), math.pi / 2, dtype=jnp.float32)]),
    ])  # (2, dim)

    # Row-tile size from the VMEM budget only.  Per-row double-buffered footprint:
    # output row (dim*4 B) + time row, which pads to a full 128-lane vreg (128*4 B).
    budget = _vmem_budget_bytes()
    bytes_per_row = (dim + 128) * 4
    tb = budget // (2 * bytes_per_row)
    tb = max(8, (tb // 8) * 8)                 # sublane multiple
    b_ceil8 = ((B + 7) // 8) * 8
    tb = min(tb, b_ceil8)                      # don't over-pad tiny batches
    # v7x megacore: ensure the "parallel" batch axis has >= 2 grid steps so both
    # TensorCores get work (only when the batch is big enough to split).
    if b_ceil8 >= 16 and pl.cdiv(b_ceil8, tb) < 2:
        tb = ((pl.cdiv(b_ceil8, 2) + 7) // 8) * 8
    b_pad = pl.cdiv(B, tb) * tb

    t2d = time.astype(jnp.float32).reshape(B, 1)
    if b_pad != B:
        t2d = jnp.pad(t2d, ((0, b_pad - B), (0, 0)))

    # TODO(synk): for dim < 128 (lanes <25% utilized, e.g. this dim=32 demo) a
    # fused XLA elementwise beats any standalone kernel; Pallas path kept as required.
    out = pl.pallas_call(
        _sinusoidal_kernel,
        out_shape=jax.ShapeDtypeStruct((b_pad, dim), jnp.float32),
        grid=(b_pad // tb,),
        in_specs=[
            pl.BlockSpec((tb, 1), lambda i: (i, 0)),       # time rows, tiled
            pl.BlockSpec((2, dim), lambda i: (0, 0)),      # constants, VMEM-resident
        ],
        out_specs=pl.BlockSpec((tb, dim), lambda i: (i, 0)),
        compiler_params=pltpu.CompilerParams(
            dimension_semantics=("parallel",),             # megacore split on v7x
            vmem_limit_bytes=budget + (8 << 20),           # lift v5e's 16 MiB scoped default
        ),
        cost_estimate=pl.CostEstimate(
            flops=2 * b_pad * dim,                         # broadcast mul + phase add
            transcendentals=b_pad * dim,                   # one sin per output element
            bytes_accessed=4 * (b_pad + 2 * dim + b_pad * dim),
        ),
    )(t2d, consts)

    return out[:B] if b_pad != B else out


def _reference(time: jax.Array, dim: int) -> jax.Array:
    half_dim = dim // 2
    scale = math.log(10000.0) / (half_dim - 1)
    freqs = jnp.exp(jnp.arange(half_dim, dtype=jnp.float32) * -scale)
    args = time.astype(jnp.float32)[:, None] * freqs[None, :]
    return jnp.concatenate([jnp.sin(args), jnp.cos(args)], axis=-1)


if __name__ == "__main__":
    key = jax.random.PRNGKey(0)
    B, dim = 8, 32
    # deterministic "timestep" inputs, as the diffusion-style module expects
    time = jax.random.uniform(key, (B,), dtype=jnp.float32, minval=0.0, maxval=1000.0)

    out = sinusoidal_position_embeddings(time, dim)
    out = jax.block_until_ready(out)

    ref = _reference(time, dim)
    assert out.shape == (B, dim)
    # atol=1e-4: the cos half is computed as sin(x + pi/2); the f32 argument add
    # rounds by up to ~ulp(x)/2 (~3e-5 at x ~ 1000), exact in real-number math.
    assert jnp.allclose(out, ref, atol=1e-4, rtol=1e-4), "mismatch vs reference"

    print("KERNEL_OK")
</pallas_src>

<mosaic_0001>
module attributes {stable_mosaic.version = 11 : i64} {
  func.func @_sinusoidal_kernel(%arg0: i32, %arg1: memref<8x1xf32, #tpu.memory_space<vmem>>, %arg2: memref<2x32xf32, #tpu.memory_space<vmem>>, %arg3: memref<8x32xf32, #tpu.memory_space<vmem>>) attributes {dimension_semantics = [#tpu.dimension_semantics<parallel>], iteration_bounds = array<i64: 1>, scalar_prefetch = 0 : i64, scratch_operands = 0 : i64, tpu.core_type = #tpu.core_type<tc>, window_params = [{transform_indices = @transform_0, window_bounds = array<i64: 8, 1>}, {pipeline_mode = #tpu.pipeline_mode<synchronous>, transform_indices = @transform_1, window_bounds = array<i64: 2, 32>}, {transform_indices = @transform_2, window_bounds = array<i64: 8, 32>}]} {
    %c0 = arith.constant 0 : index
    %c0_0 = arith.constant 0 : index
    %0 = vector.load %arg2[%c0, %c0_0] : memref<2x32xf32, #tpu.memory_space<vmem>>, vector<1x32xf32>
    %c1 = arith.constant 1 : index
    %c0_1 = arith.constant 0 : index
    %1 = vector.load %arg2[%c1, %c0_1] : memref<2x32xf32, #tpu.memory_space<vmem>>, vector<1x32xf32>
    %c0_2 = arith.constant 0 : index
    %c0_3 = arith.constant 0 : index
    %2 = vector.load %arg1[%c0_2, %c0_3] : memref<8x1xf32, #tpu.memory_space<vmem>>, vector<8x1xf32>
    %3 = vector.broadcast %2 : vector<8x1xf32> to vector<8x32xf32>
    %4 = vector.broadcast %0 : vector<1x32xf32> to vector<8x32xf32>
    %5 = arith.mulf %3, %4 : vector<8x32xf32>
    %6 = vector.broadcast %1 : vector<1x32xf32> to vector<8x32xf32>
    %7 = arith.addf %5, %6 : vector<8x32xf32>
    %8 = math.sin %7 : vector<8x32xf32>
    %c0_4 = arith.constant 0 : index
    %c0_5 = arith.constant 0 : index
    %9 = vector.load %arg3[%c0_4, %c0_5] : memref<8x32xf32, #tpu.memory_space<vmem>>, vector<8x32xf32>
    tpu.vector_store %arg3[%c0_4, %c0_5], %8 {strides = array<i32>} : memref<8x32xf32, #tpu.memory_space<vmem>>, vector<8x32xf32>,
    return
  }
  func.func @transform_0(%arg0: i32) -> (i32, i32) {
    %c0_i32 = arith.constant 0 : i32
    %c0_i32_0 = arith.constant 0 : i32
    return %arg0, %c0_i32 : i32, i32
  }
  func.func @transform_1(%arg0: i32) -> (i32, i32) {
    %c0_i32 = arith.constant 0 : i32
    %c0_i32_0 = arith.constant 0 : i32
    %c0_i32_1 = arith.constant 0 : i32
    return %c0_i32, %c0_i32_0 : i32, i32
  }
  func.func @transform_2(%arg0: i32) -> (i32, i32) {
    %c0_i32 = arith.constant 0 : i32
    %c0_i32_0 = arith.constant 0 : i32
    return %arg0, %c0_i32 : i32, i32
  }
}

</mosaic_0001>

<bundles_post_ra>
// kernel: tpu_custom_call.1
= control target key start
LH: loop header
LB: loop body
LE: loop exit
PB: predicated region body
PF: predicated region fallthrough
CT: control target
= control target key end

     0   :  { %v237_v1 = vmov 0   ;;  %s333_s0 = inlined_call_operand.vmem [shape: f32[8,1], index: 0, kind: input, shape index: {}]   ;;  %s334_s1 = inlined_call_operand.vmem [shape: f32[2,32], index: 1, kind: input, shape index: {}]   ;;  %s335_s2 = inlined_call_operand.hbm [shape: f32[8,32], index: 2, kind: output, shape index: {}]  }
   0x1   :  { %v14_v0 = vld [vmem:[%s333_s0] sm:$0xff]  ;;  %208 = vset.pattern.permute.xlu0 %v237_v1 }
   0x2   :  { %17 = vperm.xlu0 %208, %v14_v0  }
   0x3   :  { %7 = vsyncpa [#allocation3], 0  ;;  %v209_v2 = vld [vmem:[%s334_s1] ss:$0 sm:$0xff]  ;;  %v210_v3 = vld [vmem:[%s334_s1 + $0x1] ss:$0 sm:$0xff] }
   0x4   :  { %v238_v18 = vmov 683565275   ;;  %v239_v20 = vmov 2475754826   ;;  %v240_v23 = vmov 2131351028  }
   0x5   :  { %v241_v26 = vmov 2102212464   ;;  %v242_v29 = vmov 920167782   ;;  %v243_v32 = vmov 1326507024  }
   0x6   :  { %s244_s0 = smov [#allocation2]   ;;  %s188_s17 = sshll.u32 %s335_s2, 4  ;;  %s189_s17 = int_to_ptr.hbm [resolvable:$true] %s188_s17 }
   0x7   :  { %s186_s1 = sshll.u32 %s244_s0, 4  ;;  %s187_s1 = int_to_ptr.vmem [resolvable:$true] %s186_s1 }
  0x74   :  { %v18_v4 = vpop.permute.xlu0 %17 }
  0x75   :  { %v21_v5 = vmul.f32 %v209_v2, %v18_v4 }
  0x77   :  { %v270_v6 = vadd.f32 %v210_v3, %v21_v5 }
  0x79   :  { %v27_v7 = vand.u32 2139095040, %v270_v6  ;;  %v24_v10 = vand.u32 2147483647, %v270_v6  ;;  %vm26_vm12 = vcmp.lt.s32.totalorder %v270_v6, 0 }
  0x7b   :  { %v28_v8 = vshrl.u32 %v27_v7, 23  ;;  %v31_v12 = vand.u32 8388607, %v24_v10  ;;  %vm25_vm13 = vcmp.le.f32.partialorder %v24_v10, 0.7853982 }
  0x7d   :  { %v197_v9 = vadd.s32 4294967169, %v28_v8  ;;  %v32_v16 = vor.u32 8388608, %v31_v12 }
  0x7f   :  { %v34_v11 = vadd.s32 1, %v197_v9  ;;  %v287_v39 = vshll.u32 %v32_v16, 8 }
  0x81   :  { %vm35_vm0 = vcmp.gt.s32.totalorder %v34_v11, 0  ;;  %v73_v48 = vand.u32 65535, %v287_v39  ;;  %v74_v53 = vshrl.u32 %v287_v39, 16 }
  0x82   :  { %v36_v13 = vsel %vm35_vm0, %v34_v11, 0 }
  0x83   :  { %v38_v14 = vand.u32 31, %v36_v13  ;;  %v278_v17 = vshrl.u32 %v36_v13, 5 }
  0x85   :  { %v276_v15 = vsub.s32 32, %v38_v14  ;;  %v41_v19 = vshll.u32 %v238_v18, %v38_v14  ;;  %v44_v21 = vshll.u32 %v239_v20, %v38_v14  ;;  %v47_v25 = vshll.u32 %v240_v23, %v38_v14 }
  0x86   :  { %v50_v28 = vshll.u32 %v241_v26, %v38_v14  ;;  %v53_v31 = vshll.u32 %v242_v29, %v38_v14  ;;  %vm56_vm1 = vcmp.lt.s32.totalorder %v278_v17, 1  ;;  %vm59_vm2 = vcmp.lt.s32.totalorder %v278_v17, 4 }
  0x87   :  { %v42_v22 = vshrl.u32 %v239_v20, %v276_v15  ;;  %v45_v24 = vshrl.u32 %v240_v23, %v276_v15  ;;  %v48_v27 = vshrl.u32 %v241_v26, %v276_v15  ;;  %v51_v30 = vshrl.u32 %v242_v29, %v276_v15 }
  0x88   :  { %v54_v33 = vshrl.u32 %v243_v32, %v276_v15  ;;  %vm58_vm3 = vcmp.lt.s32.totalorder %v278_v17, 3  ;;  %vm57_vm4 = vcmp.lt.s32.totalorder %v278_v17, 2  ;;  %v40_v12 = vshrl.u32 %v238_v18, %v276_v15 }
  0x89   :  { %v43_v34 = vor.u32 %v42_v22, %v41_v19  ;;  %v46_v35 = vor.u32 %v45_v24, %v44_v21  ;;  %v49_v36 = vor.u32 %v48_v27, %v47_v25  ;;  %v52_v37 = vor.u32 %v51_v30, %v50_v28 }
  0x8a   :  { %v55_v38 = vor.u32 %v54_v33, %v53_v31 }
  0x8b   :  { %v64_v40 = vsel %vm56_vm1, %v43_v34, %v46_v35  ;;  %v68_v41 = vsel %vm56_vm1, %v46_v35, %v49_v36  ;;  %v65_v42 = vsel %vm59_vm2, %v52_v37, 920167782  ;;  %v61_v5 = vsel %vm59_vm2, %v49_v36, 2102212464 }
  0x8c   :  { %v69_v43 = vsel %vm59_vm2, %v55_v38, 1326507024  ;;  %v66_v44 = vsel %vm58_vm3, %v49_v36, %v65_v42  ;;  %v60_v22 = vsel %vm56_vm1, %v40_v12, %v43_v34  ;;  %v62_v23 = vsel %vm58_vm3, %v46_v35, %v61_v5 }
  0x8d   :  { %v70_v45 = vsel %vm58_vm3, %v52_v37, %v69_v43  ;;  %v67_v46 = vsel %vm57_vm4, %v64_v40, %v66_v44  ;;  %v63_v15 = vsel %vm57_vm4, %v60_v22, %v62_v23  ;;  %vm179_vm1 = vcmask 261120  }
  0x8e   :  { %v71_v47 = vsel %vm57_vm4, %v68_v41, %v70_v45  ;;  %v97_v51 = vand.u32 65535, %v67_v46  ;;  %v98_v52 = vshrl.u32 %v67_v46, 16  ;;  %v117_v30 = vmul.u32 %v287_v39, %v63_v15 }
  0x8f   :  { %v75_v49 = vand.u32 65535, %v71_v47  ;;  %v76_v50 = vshrl.u32 %v71_v47, 16  ;;  %vm167_vm2 = vweird.f32 %v270_v6 }
  0x90   :  { %v100_v55 = vmul.u32 %v98_v52, %v73_v48  ;;  %v101_v57 = vmul.u32 %v97_v51, %v74_v53  ;;  %v99_v60 = vmul.u32 %v97_v51, %v73_v48  ;;  %v102_v63 = vmul.u32 %v98_v52, %v74_v53 }
  0x91   :  { %v78_v54 = vmul.u32 %v76_v50, %v73_v48  ;;  %v79_v56 = vmul.u32 %v75_v49, %v74_v53  ;;  %v77_v58 = vmul.u32 %v75_v49, %v73_v48  ;;  %v80_v62 = vmul.u32 %v76_v50, %v74_v53 }
  0x92   :  { %v103_v61 = vshll.u32 %v100_v55, 16  ;;  %v105_v2 = vshll.u32 %v101_v57, 16  ;;  %v104_v20 = vshrl.u32 %v100_v55, 16  ;;  %v106_v26 = vshrl.u32 %v101_v57, 16 }
  0x93   :  { %v81_v59 = vshll.u32 %v78_v54, 16  ;;  %v83_v0 = vshll.u32 %v79_v56, 16  ;;  %v82_v16 = vshrl.u32 %v78_v54, 16  ;;  %v84_v24 = vshrl.u32 %v79_v56, 16 }
  0x94   :  { %vm107_vm6 = vc.u32 %v99_v60, %v103_v61  ;;  %v109_v4 = vadd.s32 %v103_v61, %v99_v60 }
  0x95   :  { %vm85_vm5 = vc.u32 %v77_v58, %v81_v59  ;;  %v87_v3 = vadd.s32 %v81_v59, %v77_v58  ;;  %v108_v8 = vsel %vm107_vm6, 1, %v237_v1 }
  0x96   :  { %v86_v7 = vsel %vm85_vm5, 1, %v237_v1  ;;  %v110_v11 = vadd.s32 %v108_v8, %v102_v63  ;;  %vm111_vm8 = vc.u32 %v109_v4, %v105_v2  ;;  %v113_v28 = vadd.s32 %v109_v4, %v105_v2 }
  0x97   :  { %v88_v9 = vadd.s32 %v86_v7, %v80_v62  ;;  %vm89_vm7 = vc.u32 %v87_v3, %v83_v0  ;;  %v112_v14 = vsel %vm111_vm8, 1, %v237_v1 }
  0x98   :  { %v90_v13 = vsel %vm89_vm7, 1, %v237_v1  ;;  %v114_v21 = vadd.s32 %v112_v14, %v110_v11 }
  0x99   :  { %v92_v19 = vadd.s32 %v90_v13, %v88_v9 }
  0x9a   :  { %v115_v27 = vadd.s32 %v114_v21, %v104_v20 }
  0x9b   :  { %v93_v25 = vadd.s32 %v92_v19, %v82_v16 }
  0x9c   :  { %v116_v1 = vadd.s32 %v115_v27, %v106_v26 }
  0x9d   :  { %v94_v18 = vadd.s32 %v93_v25, %v84_v24 }
  0x9e   :  { %v120_v29 = vadd.s32 1, %v116_v1 }
  0x9f   :  { %vm119_vm9 = vc.u32 %v94_v18, %v113_v28  ;;  %v118_v42 = vadd.s32 %v113_v28, %v94_v18 }
  0xa0   :  { %v121_v31 = vsel %vm119_vm9, %v120_v29, %v116_v1 }
  0xa1   :  { %v122_v32 = vadd.s32 %v121_v31, %v117_v30 }
  0xa3   :  { %v123_v33 = vadd.s32 536870912, %v122_v32 }
  0xa5   :  { %v124_v34 = vshrl.u32 %v123_v33, 30 }
  0xa7   :  { %v125_v36 = vshll.u32 %v124_v34, 30  ;;  %v148_v55 = vsub.s32 4, %v124_v34 }
  0xa9   :  { %v126_v35 = vsub.s32 %v122_v32, %v125_v36  ;;  %v149_v60 = vsel %vm26_vm12, %v148_v55, %v124_v34 }
  0xaa   :  { %v151_v63 = vsel %vm25_vm13, 0, %v149_v60 }
  0xab   :  { %vm127_vm10 = vcmp.lt.s32.totalorder %v126_v35, 0  ;;  %v128_v37 = vsub.s32 0, %v126_v35  ;;  %v168_v5 = vadd.s32 3, %v151_v63 }
  0xad   :  { %v129_v38 = vsel %vm127_vm10, %v128_v37, %v126_v35  ;;  %v169_v11 = vand.u32 3, %v168_v5 }
  0xae   :  { %v130_v40 = vclz %v129_v38 }
  0xaf   :  { %vm171_vm14 = vcmp.eq.s32.totalorder %v169_v11, 0  ;;  %vm174_vm15 = vcmp.eq.s32.totalorder %v169_v11, 2  ;;  %vm170_vm0 = vcmp.lt.s32.totalorder %v169_v11, 2 }
  0xb0   :  { %v198_v41 = vadd.s32 4294967294, %v130_v40 }
  0xb2   :  { %vm199_vm11 = vcmp.lt.s32.totalorder %v198_v41, 0 }
  0xb3   :  { %v133_v17 = vsel %vm199_vm11, 0, %v198_v41 }
  0xb4   :  { %v134_v43 = vsub.s32 32, %v133_v17  ;;  %v138_v44 = vsub.s32 4294967266, %v133_v17  ;;  %v135_v45 = vshll.u32 %v126_v35, %v133_v17 }
  0xb6   :  { %v136_v46 = vshrl.u32 %v118_v42, %v134_v43  ;;  %v139_v47 = vadd.s32 127, %v138_v44 }
  0xb8   :  { %v137_v39 = vor.u32 %v136_v46, %v135_v45  ;;  %v140_v48 = vshll.u32 %v139_v47, 23 }
  0xba   :  { %v141_v49 = vor.u32 4788187, %v140_v48  ;;  %v144_v51 = vcvt.s32.f32 %v137_v39 }
  0xbc   :  { %v142_v50 = vand.u32 2147483647, %v141_v49 }
  0xbe   :  { %v145_v52 = vmul.f32 %v144_v51, %v142_v50 }
  0xc0   :  { %v146_v53 = vxor.u32 2147483648, %v145_v52 }
  0xc2   :  { %v147_v54 = vsel %vm26_vm12, %v146_v53, %v145_v52 }
  0xc3   :  { %v150_v56 = vsel %vm25_vm13, %v270_v6, %v147_v54 }
  0xc4   :  { %v152_v57 = vmul.f32 %v150_v56, %v150_v56 }
  0xc6   :  { %v153_v58 = vmul.f32 -0.001358992, %v152_v57  ;;  %v160_v59 = vmul.f32 -0.00019511016, %v152_v57 }
  0xc8   :  { %v154_v61 = vadd.f32 0.041655596, %v153_v58  ;;  %v161_v62 = vadd.f32 0.008332121, %v160_v59 }
  0xca   :  { %v155_v0 = vmul.f32 %v154_v61, %v152_v57  ;;  %v162_v2 = vmul.f32 %v161_v62, %v152_v57 }
  0xcc   :  { %v156_v3 = vadd.f32 -0.4999988, %v155_v0  ;;  %v163_v4 = vadd.f32 -0.16666654, %v162_v2 }
  0xce   :  { %v157_v7 = vmul.f32 %v156_v3, %v152_v57  ;;  %v164_v8 = vmul.f32 %v163_v4, %v152_v57 }
  0xd0   :  { %v158_v9 = vadd.f32 1.0, %v157_v7  ;;  %v165_v10 = vadd.f32 1.0, %v164_v8 }
  0xd2   :  { %v166_v12 = vmul.f32 %v165_v10, %v150_v56  ;;  %v175_v13 = vxor.u32 2147483648, %v158_v9 }
  0xd4   :  { %v172_v14 = vxor.u32 2147483648, %v166_v12  ;;  %v176_v19 = vsel %vm174_vm15, %v175_v13, %v166_v12 }
  0xd6   :  { %v173_v16 = vsel %vm171_vm14, %v158_v9, %v172_v14 }
  0xd7   :  { %v177_v20 = vsel %vm170_vm0, %v173_v16, %v176_v19 }
  0xd8   :  { %v178_v21 = vsel %vm167_vm2, nan, %v177_v20 }
  0xd9   :  { %180 = vst.msk [vmem:[#allocation2] sm:$0xff] %vm179_vm1, %v178_v21 }
  0xda   :  { %191 = dma.vmem_to_hbm [thread:$0]  %s187_s1, 128, %s189_s17, [#allocation3]  }
  0xdb   :  { %235 = dma.done.wait [#allocation3], 128  }
  0xdc   :  { %236 = vsyncadd [#allocation3], 4294967168 }
  0xdd   :  { %196 = vsyncpa [#allocation3], 1 }

</bundles_post_ra>
